<compile_context>
chip_gen: v7x
topology: tpu7x:2x2x1
jax: 0.10.0
libtpu: 0.0.40
codegen_flags: <defaults>
</compile_context>

<pallas_src>
import jax
import jax.numpy as jnp
from jax.experimental import pallas as pl
from jax.experimental.pallas import tpu as pltpu


def _round_up(x, m):
    return (x + m - 1) // m * m


def language_model_criterion(inp, target, mask, *, tile_n=None, tile_v=None):
    """inp: (B, T, V) f32/bf16 log-probs, target: (B, >=T) int, mask: (B, >=T).

    Returns scalar f32 = sum(-inp.gather(2, target) * mask) / sum(mask).
    """
    B, T, V = inp.shape
    # glue: slice target/mask to input's time length (as in the PyTorch forward)
    target = target[:, :T].astype(jnp.int32)
    mask = mask[:, :T].astype(jnp.float32)

    N = B * T
    inp_flat = inp.reshape(N, V)
    tgt_flat = target.reshape(N, 1)
    msk_flat = mask.reshape(N, 1)

    # denom is a tiny (B*T) reduce -> compute in the wrapper (XLA fuses it),
    # and do it BEFORE any padding so padded rows cannot contribute.
    denom = jnp.sum(msk_flat)

    # ---- tile selection (multiples of (8, 128), VMEM-friendly sizes) --------
    if tile_n is None:
        tile_n = min(512, _round_up(N, 8))
    tile_n = max(8, _round_up(int(tile_n), 8))

    if tile_v is None:
        tile_v = min(V, 2048)
    if tile_v >= V:
        tile_v = V                      # full vocab dim in one block (always legal)
        v_pad = V
    else:
        tile_v = max(128, _round_up(int(tile_v), 128))
        v_pad = _round_up(V, tile_v)

    n_pad = _round_up(N, tile_n)

    # ---- pad so the grid divides evenly (padding contributes exactly 0) -----
    if n_pad != N or v_pad != V:
        inp_flat = jnp.pad(inp_flat, ((0, n_pad - N), (0, v_pad - V)))
    if n_pad != N:
        tgt_flat = jnp.pad(tgt_flat, ((0, n_pad - N), (0, 0)))   # target 0
        msk_flat = jnp.pad(msk_flat, ((0, n_pad - N), (0, 0)))   # mask 0

    n_row_tiles = n_pad // tile_n
    n_vocab_tiles = v_pad // tile_v

    def kernel(inp_ref, tgt_ref, msk_ref, out_ref):
        j = pl.program_id(1)

        # accumulator lives in the resident output block across the vocab axis
        @pl.when(j == 0)
        def _():
            out_ref[...] = jnp.zeros_like(out_ref)

        x = inp_ref[...].astype(jnp.float32)                 # (tile_n, tile_v)
        tgt = tgt_ref[...]                                   # (tile_n, 1) int32
        msk = msk_ref[...]                                   # (tile_n, 1) f32

        # gather(2, target) restricted to this vocab chunk: at most one column
        # per row matches, so the lane-sum of the where-select is exact.
        ids = jax.lax.broadcasted_iota(jnp.int32, x.shape, 1) + j * tile_v
        sel = jnp.where(ids == tgt, x, 0.0)                  # (tile_n, tile_v)
        per_row = jnp.sum(sel, axis=1, keepdims=True)        # (tile_n, 1)
        partial = jnp.sum(per_row * (-msk))                  # masked -NLL, scalar

        out_ref[...] = out_ref[...] + partial                # f32 accumulate

    partials = pl.pallas_call(
        kernel,
        out_shape=jax.ShapeDtypeStruct((n_row_tiles, 8, 128), jnp.float32),
        grid_spec=pltpu.PrefetchScalarGridSpec(
            num_scalar_prefetch=0,
            grid=(n_row_tiles, n_vocab_tiles),
            in_specs=[
                pl.BlockSpec((tile_n, tile_v), lambda i, j: (i, j)),
                pl.BlockSpec((tile_n, 1), lambda i, j: (i, 0)),
                pl.BlockSpec((tile_n, 1), lambda i, j: (i, 0)),
            ],
            out_specs=pl.BlockSpec((1, 8, 128), lambda i, j: (i, 0, 0)),
        ),
        compiler_params=pltpu.CompilerParams(
            dimension_semantics=("parallel", "arbitrary"),
            vmem_limit_bytes=32 * 1024 * 1024,
        ),
    )(inp_flat, tgt_flat, msk_flat)

    numer = jnp.sum(partials[:, 0, 0])
    # NOTE: 0/0 -> NaN when mask is all zeros, matching the PyTorch module.
    return numer / denom


if __name__ == "__main__":
    key = jax.random.PRNGKey(0)
    B, T, V = 2, 8, 256
    Tp = T + 2  # target/mask longer than input time dim (exercises the slicing)
    k1, k2, k3 = jax.random.split(key, 3)

    # deterministic synthetic inputs: log-softmax scores, targets, padding mask
    logits = jax.random.normal(k1, (B, T, V), dtype=jnp.float32)
    logp = jax.nn.log_softmax(logits, axis=-1)
    target = jax.random.randint(k2, (B, Tp), 0, V)
    lens = jnp.array([T, T - 3], dtype=jnp.int32)
    mask = (jnp.arange(Tp)[None, :] < lens[:, None]).astype(jnp.float32)

    # pure-JAX reference
    tgt_s = target[:, :T]
    msk_s = mask[:, :T]
    gathered = jnp.take_along_axis(logp, tgt_s[..., None], axis=2)[..., 0]
    ref = jnp.sum(-gathered * msk_s) / jnp.sum(msk_s)

    # small tiles -> exercises the 2x2 tiled / accumulator path
    loss = language_model_criterion(logp, target, mask, tile_n=8, tile_v=128)
    jax.block_until_ready(loss)
    assert jnp.allclose(loss, ref, atol=1e-5, rtol=1e-5), (loss, ref)

    # default (auto) tile path: full-vocab block, single grid step
    loss2 = language_model_criterion(logp, target, mask)
    jax.block_until_ready(loss2)
    assert jnp.allclose(loss2, ref, atol=1e-5, rtol=1e-5), (loss2, ref)

    # bf16 input path (f32 accumulation inside the kernel)
    loss3 = language_model_criterion(logp.astype(jnp.bfloat16), target, mask)
    jax.block_until_ready(loss3)
    assert jnp.allclose(loss3, ref, atol=2e-2, rtol=2e-2), (loss3, ref)

    print("KERNEL_OK")
</pallas_src>

<mosaic_0001>
module attributes {stable_mosaic.version = 11 : i64} {
  func.func @kernel(%arg0: i32, %arg1: i32, %arg2: memref<8x128xf32, #tpu.memory_space<vmem>>, %arg3: memref<8x1xi32, #tpu.memory_space<vmem>>, %arg4: memref<8x1xf32, #tpu.memory_space<vmem>>, %arg5: memref<1x8x128xf32, #tpu.memory_space<vmem>>) attributes {dimension_semantics = [#tpu.dimension_semantics<parallel>, #tpu.dimension_semantics<arbitrary>], iteration_bounds = array<i64: 2, 2>, scalar_prefetch = 0 : i64, scratch_operands = 0 : i64, tpu.core_type = #tpu.core_type<tc>, window_params = [{transform_indices = @transform_0, window_bounds = array<i64: 8, 128>}, {transform_indices = @transform_1, window_bounds = array<i64: 8, 1>}, {transform_indices = @transform_2, window_bounds = array<i64: 8, 1>}, {transform_indices = @transform_3, window_bounds = array<i64: 1, 8, 128>}]} {
    %c0_i32 = arith.constant 0 : i32
    %0 = arith.cmpi eq, %arg1, %c0_i32 : i32
    %1 = arith.extui %0 : i1 to i32
    %c0_i32_0 = arith.constant 0 : i32
    %2 = arith.cmpi ne, %1, %c0_i32_0 : i32
    scf.if %2 {
      %cst_15 = arith.constant 0.000000e+00 : f32
      %27 = vector.broadcast %cst_15 : f32 to vector<1x8x128xf32>
      %c0_16 = arith.constant 0 : index
      %c0_17 = arith.constant 0 : index
      %c0_18 = arith.constant 0 : index
      %28 = vector.load %arg5[%c0_16, %c0_17, %c0_18] : memref<1x8x128xf32, #tpu.memory_space<vmem>>, vector<1x8x128xf32>
      tpu.vector_store %arg5[%c0_16, %c0_17, %c0_18], %27 {strides = array<i32>} : memref<1x8x128xf32, #tpu.memory_space<vmem>>, vector<1x8x128xf32>,
    } else {
    }
    %c0 = arith.constant 0 : index
    %c0_1 = arith.constant 0 : index
    %3 = vector.load %arg2[%c0, %c0_1] : memref<8x128xf32, #tpu.memory_space<vmem>>, vector<8x128xf32>
    %c0_2 = arith.constant 0 : index
    %c0_3 = arith.constant 0 : index
    %4 = vector.load %arg3[%c0_2, %c0_3] : memref<8x1xi32, #tpu.memory_space<vmem>>, vector<8x1xi32>
    %c0_4 = arith.constant 0 : index
    %c0_5 = arith.constant 0 : index
    %5 = vector.load %arg4[%c0_4, %c0_5] : memref<8x1xf32, #tpu.memory_space<vmem>>, vector<8x1xf32>
    %6 = tpu.iota {dimensions = array<i32: 1>} : vector<8x128xi32>
    %c128_i32 = arith.constant 128 : i32
    %7 = arith.muli %arg1, %c128_i32 : i32
    %8 = vector.broadcast %7 : i32 to vector<8x128xi32>
    %9 = arith.addi %6, %8 : vector<8x128xi32>
    %10 = vector.broadcast %4 : vector<8x1xi32> to vector<8x128xi32>
    %11 = arith.cmpi eq, %9, %10 : vector<8x128xi32>
    %cst = arith.constant 0.000000e+00 : f32
    %12 = vector.broadcast %cst : f32 to vector<8x128xf32>
    %13 = arith.select %11, %3, %12 : vector<8x128xi1>, vector<8x128xf32>
    %cst_6 = arith.constant dense<0.000000e+00> : vector<8xf32>
    %14 = vector.multi_reduction <add>, %13, %cst_6 [1] : vector<8x128xf32> to vector<8xf32>
    %15 = vector.shape_cast %14 : vector<8xf32> to vector<8x1xf32>
    %cst_7 = arith.constant 0.000000e+00 : f32
    %16 = vector.broadcast %cst_7 : f32 to vector<8x1xf32>
    %17 = arith.subf %16, %5 : vector<8x1xf32>
    %18 = arith.mulf %15, %17 : vector<8x1xf32>
    %19 = vector.shape_cast %18 : vector<8x1xf32> to vector<1x8x1xf32>
    %cst_8 = arith.constant dense<0.000000e+00> : vector<1xf32>
    %20 = vector.multi_reduction <add>, %19, %cst_8 [1, 2] : vector<1x8x1xf32> to vector<1xf32>
    %21 = vector.shape_cast %20 : vector<1xf32> to vector<1x1x1xf32>
    %22 = vector.extract %21[0, 0, 0] : f32 from vector<1x1x1xf32>
    %c0_9 = arith.constant 0 : index
    %c0_10 = arith.constant 0 : index
    %c0_11 = arith.constant 0 : index
    %23 = vector.load %arg5[%c0_9, %c0_10, %c0_11] : memref<1x8x128xf32, #tpu.memory_space<vmem>>, vector<1x8x128xf32>
    %24 = vector.broadcast %22 : f32 to vector<1x8x128xf32>
    %25 = arith.addf %23, %24 : vector<1x8x128xf32>
    %c0_12 = arith.constant 0 : index
    %c0_13 = arith.constant 0 : index
    %c0_14 = arith.constant 0 : index
    %26 = vector.load %arg5[%c0_12, %c0_13, %c0_14] : memref<1x8x128xf32, #tpu.memory_space<vmem>>, vector<1x8x128xf32>
    tpu.vector_store %arg5[%c0_12, %c0_13, %c0_14], %25 {strides = array<i32>} : memref<1x8x128xf32, #tpu.memory_space<vmem>>, vector<1x8x128xf32>,
    return
  }
  func.func @transform_0(%arg0: i32, %arg1: i32) -> (i32, i32) {
    %c0_i32 = arith.constant 0 : i32
    return %arg0, %arg1 : i32, i32
  }
  func.func @transform_1(%arg0: i32, %arg1: i32) -> (i32, i32) {
    %c0_i32 = arith.constant 0 : i32
    %c0_i32_0 = arith.constant 0 : i32
    return %arg0, %c0_i32 : i32, i32
  }
  func.func @transform_2(%arg0: i32, %arg1: i32) -> (i32, i32) {
    %c0_i32 = arith.constant 0 : i32
    %c0_i32_0 = arith.constant 0 : i32
    return %arg0, %c0_i32 : i32, i32
  }
  func.func @transform_3(%arg0: i32, %arg1: i32) -> (i32, i32, i32) {
    %c0_i32 = arith.constant 0 : i32
    %c0_i32_0 = arith.constant 0 : i32
    %c0_i32_1 = arith.constant 0 : i32
    return %arg0, %c0_i32, %c0_i32_0 : i32, i32, i32
  }
}

</mosaic_0001>

<bundles_post_ra>
// kernel: tpu_custom_call.1
= control target key start
LH: loop header
LB: loop body
LE: loop exit
PB: predicated region body
PF: predicated region fallthrough
CT: control target
= control target key end

     0   :  { %8 = vsyncpa [#allocation3], 0  ;;  %s740_s0 = inlined_call_operand.vmem [shape: f32[16,256], index: 0, kind: input, shape index: {}]   ;;  %s741_s1 = inlined_call_operand.vmem [shape: s32[16,1], index: 1, kind: input, shape index: {}]   ;;  %s742_s2 = inlined_call_operand.vmem [shape: f32[16,1], index: 2, kind: input, shape index: {}]   ;;  %s743_s3 = inlined_call_operand.hbm [shape: f32[2,8,128], index: 3, kind: output, shape index: {}]  }
   0x1   :  { %10 = vsyncpa [#allocation3 + $0x1], 0  ;;  %s588_s12 = smov 0   ;;  %s590_s13 = smov 0  }
   0x2   :  { %s592_s14 = smov 0   ;;  %s594_s15 = smov 0  }
   0x3   :  { %s596_s16 = smov 0   ;;  %s598_s17 = smov 0  }
   0x4   :  { %s600_s18 = smov 0   ;;  %s602_s19 = smov 0  }
   0x5 LB: > { %747 = sst [smem:[#allocation5_spill]] %s559_s18  ;;  %s377_s20 = sadd.s32 4294967295, %s563_s19   ;;  %s563_s19 = sphi %s602_s19, %s16_s19   ;;  %s559_s18 = sphi %s600_s18, %s755_s18   ;;  %s555_s17 = sphi %s598_s17, %s760_s17   ;;  %s551_s16 = sphi %s596_s16, %s753_s16   ;;  %s547_s15 = sphi %s594_s15, %s759_s15   ;;  %s543_s14 = sphi %s592_s14, %s758_s14   ;;  %s539_s13 = sphi %s590_s13, %s757_s13   ;;  %s535_s12 = sphi %s588_s12, %s756_s12  }
   0x6   : > { %s378_s21 = sadd.s32 4294967294, %s563_s19   ;;  %s25_s22 = sadd.s32 1, %s555_s17 }
   0x7   : > { %p26_p0 = scmp.ge.s32.totalorder %s25_s22, 2  ;;  %s28_s23 = sadd.s32 1, %s559_s18 }
   0x8   : > { %p125_p1 = scmp.ne.s32.totalorder %s543_s14, %s539_s13  ;;  %p126_p2 = scmp.eq.s32.totalorder %s377_s20, 3 }
   0x9   : > { %s762_s22 = smov (%p26_p0, %s25_s22), 0  ;;  %s764_s23 = smov (!%p26_p0, %s28_s23), %s559_s18 }
   0xa   : > { %748 = sst [smem:[#allocation6_spill]] %s762_s22  ;;  %p637_p3 = por %p126_p2, %p125_p1 }
   0xb   : > { %p131_p4 = scmp.ne.s32.totalorder %s539_s13, %s535_s12  ;;  %p30_p5 = scmp.ge.s32.totalorder %s764_s23, 2 }
   0xc   : > { %p132_p6 = scmp.eq.s32.totalorder %s378_s21, 3  ;;  %p381_p7 = scmp.ge.s32.totalorder %s563_s19, 1 }
   0xd   : > { %p175_p8 = scmp.lt.s32.totalorder %s563_s19, 5  ;;  %s766_s23 = smov (%p30_p5, %s764_s23), 0 }
   0xe   : > { %750 = sst [smem:[#allocation7_spill]] %s766_s23  ;;  %p647_p9 = por %p132_p6, %p131_p4 }
   0xf   : > { %p176_p10 = pnand %p381_p7, %p175_p8  ;;  %s112_s26 = ssub.s32 %s559_s18, %s766_s23 }
  0x10   : > { %s115_s27 = sadd.s32 1, %s543_s14  ;;  %p113_p11 = scmp.eq.s32.totalorder %s112_s26, 0 }
  0x11   : > { %179 = sbr.rel (%p176_p10) target bundleno = 534 (0x216), region = 32  ;;  %s746_s29 = sand.u32 (!%p176_p10), 1, %s539_s13  }
  0x12   : > { %s655_s28 = scalar_select %p113_p11, %s543_s14, %s115_s27  }
  0x13   : > { %p210_p12 = scmp.lt.s32.totalorder (!%p176_p10), %s551_s16, 1  ;;  %s382_s30 = sshll.u32 (!%p176_p10), %s746_s29, 3 }
  0x14   : > { %p212_p13 = scmp.lt.s32.totalorder (!%p176_p10), %s547_s15, 1  ;;  %s673_s29 = scalar_lea.vmem (!%p176_p10), [#allocation2], %s382_s30 }
  0x15   : > { %p387_p0 = scmp.ne.s32.totalorder (!%p176_p10), %s547_s15, 0 }
  0x18   : > { %s211_s4 = scalar_select %p210_p12, %s551_s16, 1 }
  0x19   : > { %s213_s5 = scalar_select %p212_p13, %s547_s15, 1 }
  0x1a   : > { %s383_s6 = sshll.u32 %s211_s4, 1  ;;  %s385_s7 = sshll.u32 %s211_s4, 3  ;;  %v565_v0 = vmov (!%p387_p0), 0.0  }
  0x1b   : > { %s215_s8 = sadd.s32 %s383_s6, %s213_s5  ;;  %s221_s11 = scalar_lea.vmem %s741_s1, %s385_s7  ;;  %230 = vst [vmem:[%s673_s29] sm:$0xff] (!%p387_p0), %v565_v0 }
  0x1c   : > { %s384_s20 = sshll.u32 %s215_s8, 3  ;;  %s225_s27 = scalar_lea.vmem %s742_s2, %s385_s7 }
  0x1d   : > { %s217_s18 = scalar_lea.vmem %s740_s0, %s384_s20  ;;  %229 = sbr.rel (%p387_p0) target bundleno = 36 (0x24), region = 36 }
  0x24 PF: > { %v232_v1 = vld [vmem:[%s221_s11] sm:$0xff]  ;;  %v566_v2 = vmov 0   ;;  %v234_v3 = vlaneseq  ;;  %s388_s4 = sshll.u32 %s547_s15, 7  ;;  %vm248_vm1 = vcmask 7168   ;;  %s390_s15 = sshll.u32 %s551_s16, 7 }
  0x25   : > { %468 = vset.pattern.permute.xlu0 %v566_v2  ;;  %v237_v5 = vstv %s388_s4  ;;  %v231_v7 = vld [vmem:[%s217_s18] sm:$0xff]  ;;  %s277_s18 = sshll.u32 %s673_s29, 4  ;;  %s684_s5 = scalar_lea.hbm %s743_s3, %s390_s15  ;;  %s686_s18 = int_to_ptr.vmem [resolvable:$true] %s277_s18 }
  0x26   : > { %240 = vperm.xlu0 %468, %v232_v1   ;;  %v235_v4 = vand.u32 127, %v234_v3  ;;  %v233_v10 = vld [vmem:[%s225_s27] sm:$0xff]  ;;  %s752_s6 = sand.u32 1, %s539_s13   ;;  %s469_s8 = scalar_lea.vmem %s686_s18, 128 }
  0x27   : > { %v246_v11 = vsub.f32 0.0, %v233_v10  ;;  %v259_v22 = vld [vmem:[%s673_s29] sm:$0xff]  ;;  %s264_s7 = scalar_lea.sflag [#allocation3], %s752_s6  ;;  %p470_p1 = scmp.ne.s32.totalorder %s686_s18, %s469_s8 }
  0x28   : > { %v238_v6 = vadd.s32 %v237_v5, %v235_v4  ;;  %s567_s16 = smov [#allocation2]  }
  0x29   : > { %p471_p2 = pnand %p470_p1, %p637_p3  ;;  %s473_s9 = sshll.u32 %s567_s16, 4  ;;  %s474_s9 = int_to_ptr.vmem [resolvable:$false] %s473_s9 }
  0x2a   : > { %s475_s10 = scalar_lea.vmem %s474_s9, 256  ;;  %p476_p5 = scmp.lt.s32.totalorder %s686_s18, %s474_s9 }
  0x2b   : > { %p472_p4 = pneg %p471_p2  ;;  %p477_p6 = scmp.lt.s32.totalorder %s475_s10, %s469_s8 }
  0x2d   : > { %p478_p7 = por %p477_p6, %p476_p5 }
  0x2f   : > { %p479_p8 = pnand %p478_p7, %p472_p4 }
  0xa5   : > { %v241_v8 = vpop.permute.xlu0 %240 }
  0xa6   : > { %vm242_vm0 = vcmp.eq.s32.totalorder %v238_v6, %v241_v8 }
  0xa7   : > { %v243_v9 = vsel %vm242_vm0, %v231_v7, 0.0 }
  0xa8   : > { %244 = vadd.xlane.f32.xlu0 %v243_v9 }
 0x135   : > { %v245_v12 = vpop.xlane.xlu0 %244 }
 0x136   : > { %v247_v13 = vmul.f32 %v246_v11, %v245_v12 }
 0x138   : > { %v249_v14 = vsel %vm248_vm1, %v247_v13, 0.0 }
 0x139   : > { %250 = vadd.xlane.f32.xlu1 %v249_v14 }
 0x1c6   : > { %v251_v15 = vpop.xlane.xlu1 %250 }
 0x1c7   : > { %v252_v16 = vrot.slane %v251_v15, 4 }
 0x1c9   : > { %v253_v17 = vadd.f32 %v252_v16, %v251_v15 }
 0x1cb   : > { %v254_v18 = vrot.slane %v253_v17, 2 }
 0x1cd   : > { %v255_v19 = vadd.f32 %v254_v18, %v253_v17 }
 0x1cf   : > { %v256_v20 = vrot.slane %v255_v19, 1 }
 0x1d1   : > { %v257_v21 = vadd.f32 %v256_v20, %v255_v19 }
 0x1d3   : > { %393 = vpush %v257_v21 }
 0x204   : > { %s394_s22 = spop %393 }
 0x205   : > { %v260_v23 = vstv %s394_s22 }
 0x206   : > { %v261_v24 = vadd.f32 %v260_v23, %v259_v22 }
 0x208   : > { %262 = vst [vmem:[%s673_s29] sm:$0xff] %v261_v24 }
 0x209   : > { %482 = shalt.err (!%p479_p8)
}
 0x20a   : > { %s483_s29 = scalar_lea.hbm %s684_s5, 128  ;;  %s487_s21 = scalar_lea.hbm %s743_s3, 256 }
 0x20b   : > { %p484_p10 = scmp.ne.s32.totalorder %s684_s5, %s483_s29  ;;  %p488_p13 = scmp.lt.u32.totalorder %s684_s5, %s743_s3 }
 0x20c   : > { %p489_p0 = scmp.lt.u32.totalorder %s487_s21, %s483_s29  ;;  %p491_p2 = scmp.lt.u32.totalorder %s483_s29, %s684_s5 }
 0x20d   : > { %p485_p11 = pnand %p484_p10, %p637_p3 }
 0x20e   : > { %p490_p1 = por %p489_p0, %p488_p13 }
 0x20f   : > { %p486_p12 = pneg %p485_p11 }
 0x210   : > { %p492_p4 = por %p491_p2, %p490_p1 }
 0x212   : > { %p493_p5 = pnand %p492_p4, %p486_p12 }
 0x214   : > { %496 = shalt.err (!%p493_p5)
}
 0x215   : > { %395 = dma.vmem_to_hbm [thread:$0]  (%p637_p3), %s686_s18, 128, %s684_s5, %s264_s7  }
 0x216 PF: > { %p401_p6 = scmp.ge.s32.totalorder %s563_s19, 2  ;;  %s289_s4 = sand.u32 1, %s535_s12  }
 0x217   : > { %s290_s15 = scalar_lea.sflag [#allocation3], %s289_s4 }
 0x218   : > { %p398_p7 = pnand %p401_p6, %p647_p9 }
 0x21a   : > { %530 = dma.done.wait (!%p398_p7), %s290_s15, 128  }
 0x21b   : > { %532 = vsyncadd (!%p398_p7), %s290_s15, 4294967168  ;;  %s16_s19 = sadd.s32 1, %s563_s19   ;;  %s753_s16 = sld [smem:[#allocation5_spill]] }
 0x21c   : > { %p13_p8 = scmp.ge.s32.totalorder %s16_s19, 6   ;;  %s754_s24 = sld [smem:[#allocation6_spill]] }
 0x21d   : > { %s755_s18 = sld [smem:[#allocation7_spill]]  ;;  %s756_s12 = smov %s539_s13 }
 0x21e   : > { %s757_s13 = smov %s543_s14  ;;  %s758_s14 = smov %s655_s28 }
 0x21f   : > { %s759_s15 = smov %s555_s17  ;;  %15 = sbr.rel (!%p13_p8) target bundleno = 5 (0x5), region = 77 }
 0x222   : > { %s760_s17 = smov %s754_s24 }
 0x226   :  { %295 = vsyncpa [#allocation3], 1 }
 0x227   :  { %297 = vsyncpa [#allocation3 + $0x1], 1 }

</bundles_post_ra>
